<compile_context>
chip_gen: v7x
topology: tpu7x:2x2x1
jax: 0.10.0
libtpu: 0.0.40
codegen_flags: <defaults>
</compile_context>

<pallas_src>
import jax
import jax.numpy as jnp
from jax import lax
from jax.experimental import pallas as pl
from jax.experimental.pallas import tpu as pltpu


def _pick_token_tile(T, cap=256):
    """Largest divisor of T that is a multiple of 8, capped; else full T."""
    for cand in range(min(T, cap), 0, -1):
        if T % cand == 0 and cand % 8 == 0:
            return cand
    return T  # e.g. CLIP's T=77: one full-length tile (block == full dim is legal)


def _acc_dtype(token_embedding, position_embedding, out_dtype):
    if token_embedding.dtype == position_embedding.dtype == out_dtype:
        return out_dtype  # e.g. pure-bf16: add directly, no f32 round trip
    return jnp.float32


def _clip_embedding_hbm_gather(tokens, token_embedding, position_embedding, tt):
    """Large-vocab path: table stays in HBM, rows gathered with manual DMAs,
    double-buffered across grid steps along the (sequential) T axis."""
    B, T = tokens.shape
    V, E = token_embedding.shape
    nT = T // tt
    out_dtype = token_embedding.dtype
    acc = _acc_dtype(token_embedding, position_embedding, out_dtype)

    # Flat 1-D int32 ids in SMEM (no 2-D SMEM padding blowup).
    tokens_flat = tokens.reshape(B * T).astype(jnp.int32)

    def kernel(tok_ref, emb_hbm, pos_ref, out_ref, rowbuf, sems):
        # tok_ref : (B*T,) int32 SMEM (scalar prefetch)
        # emb_hbm : (V, E) raw HBM ref
        # pos_ref : (T, E) VMEM-resident position embedding
        # out_ref : (1, tt, E) output tile
        # rowbuf  : (2, tt, E) double-buffered gather scratch
        # sems    : (2,) one DMA semaphore per slot
        b = pl.program_id(0)
        t = pl.program_id(1)
        slot = t % 2

        def issue_gather(tile_idx, slot_idx):
            base = b * T + tile_idx * tt
            for j in range(tt):  # static unroll; tt <= 256
                tok = tok_ref[base + j]
                tok = jnp.maximum(jnp.minimum(tok, V - 1), 0)  # clamp bad ids
                pltpu.make_async_copy(
                    emb_hbm.at[pl.ds(tok, 1), :],
                    rowbuf.at[slot_idx].at[pl.ds(j, 1), :],
                    sems.at[slot_idx],
                ).start()

        # Prime the pipeline at the start of each batch row.
        @pl.when(t == 0)
        def _prime():
            issue_gather(0, 0)

        # Prefetch the next tile (same batch row) into the other slot BEFORE
        # waiting on the current one: gather overlaps this tile's compute and
        # writeback, and all SMEM id reads happen before any .wait().
        @pl.when(t + 1 < nT)
        def _prefetch():
            issue_gather(t + 1, (t + 1) % 2)

        # Single byte-counted wait covering all tt row copies of this slot.
        pltpu.make_async_copy(rowbuf.at[slot], rowbuf.at[slot], sems.at[slot]).wait()

        rows = rowbuf[slot]                               # (tt, E)
        pos_start = pl.multiple_of(t * tt, tt)
        pos_tile = pos_ref[pl.ds(pos_start, tt), :]       # (tt, E)
        out_ref[0] = (rows.astype(acc) + pos_tile.astype(acc)).astype(out_ref.dtype)

    grid_spec = pltpu.PrefetchScalarGridSpec(
        num_scalar_prefetch=1,                 # tokens_flat -> SMEM
        grid=(B, nT),
        in_specs=[
            # Embedding table stays in HBM; gathered manually per tile.
            pl.BlockSpec(memory_space=pl.ANY),
            # Position embedding: full-array block, constant index_map ->
            # loaded once, VMEM-resident for the whole kernel.
            pl.BlockSpec((T, E), lambda b, t, tok: (0, 0)),
        ],
        out_specs=pl.BlockSpec((1, tt, E), lambda b, t, tok: (b, t, 0)),
        scratch_shapes=[
            pltpu.VMEM((2, tt, E), token_embedding.dtype),  # double-buffered gather
            pltpu.SemaphoreType.DMA((2,)),                  # one sem per slot
        ],
    )

    return pl.pallas_call(
        kernel,
        out_shape=jax.ShapeDtypeStruct((B, T, E), out_dtype),
        grid_spec=grid_spec,
        compiler_params=pltpu.CompilerParams(
            # B parallel (megacore sharding on v7x); T must be arbitrary
            # (sequential) so the cross-step gather prefetch ordering holds.
            dimension_semantics=("parallel", "arbitrary"),
        ),
    )(tokens_flat, token_embedding, position_embedding)


def _clip_embedding_vmem_table(tokens, token_embedding, position_embedding, tt):
    """Small-vocab path: table is VMEM-resident; gather via one-hot MXU matmul
    (exact: each one-hot row has a single 1.0), so no per-row HBM DMAs."""
    B, T = tokens.shape
    V, E = token_embedding.shape
    nT = T // tt
    out_dtype = token_embedding.dtype
    acc = _acc_dtype(token_embedding, position_embedding, out_dtype)

    # Tokens enter as a (B, T, 1) VMEM block so ids arrive laid out along
    # sublanes (no in-kernel relayout needed to build the one-hot).
    tokens3 = tokens.reshape(B, T, 1).astype(jnp.int32)

    def kernel(tok_ref, emb_ref, pos_ref, out_ref):
        t = pl.program_id(1)
        ids = tok_ref[0]                                   # (tt, 1) int32
        ids = jnp.maximum(jnp.minimum(ids, V - 1), 0)      # clamp bad ids
        one_hot = (ids == lax.broadcasted_iota(jnp.int32, (tt, V), 1)).astype(
            emb_ref.dtype
        )
        rows = jnp.dot(one_hot, emb_ref[...], preferred_element_type=jnp.float32)
        pos_start = pl.multiple_of(t * tt, tt)
        pos_tile = pos_ref[pl.ds(pos_start, tt), :]
        out_ref[0] = (rows.astype(acc) + pos_tile.astype(acc)).astype(out_ref.dtype)

    grid_spec = pltpu.PrefetchScalarGridSpec(
        num_scalar_prefetch=0,
        grid=(B, nT),
        in_specs=[
            pl.BlockSpec((1, tt, 1), lambda b, t: (b, t, 0)),
            pl.BlockSpec((V, E), lambda b, t: (0, 0)),      # table: VMEM-resident
            pl.BlockSpec((T, E), lambda b, t: (0, 0)),      # pos:   VMEM-resident
        ],
        out_specs=pl.BlockSpec((1, tt, E), lambda b, t: (b, t, 0)),
    )

    return pl.pallas_call(
        kernel,
        out_shape=jax.ShapeDtypeStruct((B, T, E), out_dtype),
        grid_spec=grid_spec,
        compiler_params=pltpu.CompilerParams(
            dimension_semantics=("parallel", "parallel"),
        ),
    )(tokens3, token_embedding, position_embedding)


def clip_embedding(
    tokens,
    token_embedding,
    position_embedding,
    *,
    tt=None,
    force_hbm_gather=False,
    vmem_table_limit_bytes=2 * 1024 * 1024,
):
    """tokens: (B, T) int; token_embedding: (V, E); position_embedding: (T, E)."""
    B, T = tokens.shape
    V, E = token_embedding.shape
    assert position_embedding.shape == (T, E)
    # Note: E should be a multiple of 128 for lane-dense stores (CLIP's 512/768 are).

    if tt is None:
        tt = _pick_token_tile(T)
    assert T % tt == 0, "token tile must divide sequence length"

    table_bytes = V * E * token_embedding.dtype.itemsize
    use_vmem_table = (
        (not force_hbm_gather) and table_bytes <= vmem_table_limit_bytes and V <= 2048
    )
    if use_vmem_table:
        return _clip_embedding_vmem_table(tokens, token_embedding, position_embedding, tt)
    return _clip_embedding_hbm_gather(tokens, token_embedding, position_embedding, tt)


if __name__ == "__main__":
    # Small synthetic config consistent with the module:
    #   n_vocabs=64, n_embed=128, n_tokens=32, batch=2
    n_vocabs, n_embed, n_tokens, batch = 64, 128, 32, 2

    key = jax.random.PRNGKey(0)
    k_tok, k_emb, k_pos = jax.random.split(key, 3)

    tokens = jax.random.randint(k_tok, (batch, n_tokens), 0, n_vocabs, dtype=jnp.int32)
    token_embedding = jax.random.normal(k_emb, (n_vocabs, n_embed), dtype=jnp.float32)
    # nn.Parameter(torch.zeros(...)) in __init__; deterministic nonzero init so
    # the position-add path is actually exercised.
    position_embedding = 0.01 * jax.random.normal(
        k_pos, (n_tokens, n_embed), dtype=jnp.float32
    )

    # Pure-JAX reference.
    ref = jnp.take(token_embedding, tokens, axis=0) + position_embedding[None, :, :]

    # Path 1: small-vocab VMEM-resident table (auto-selected for this config).
    out_vmem = jax.block_until_ready(
        clip_embedding(tokens, token_embedding, position_embedding)
    )
    assert out_vmem.shape == (batch, n_tokens, n_embed)
    assert jnp.allclose(out_vmem, ref, atol=1e-6), "VMEM-table path mismatch vs reference"

    # Path 2: large-vocab HBM table with double-buffered row-gather DMAs
    # (forced here, tt=8 so the cross-step prefetch/slot swap actually cycles).
    out_hbm = jax.block_until_ready(
        clip_embedding(
            tokens, token_embedding, position_embedding, tt=8, force_hbm_gather=True
        )
    )
    assert jnp.allclose(out_hbm, ref, atol=1e-6), "HBM-gather path mismatch vs reference"

    print("KERNEL_OK")
</pallas_src>

<mosaic_0001>
module attributes {stable_mosaic.version = 11 : i64} {
  func.func @kernel(%arg0: i32, %arg1: i32, %arg2: memref<1x32x1xi32, #tpu.memory_space<vmem>>, %arg3: memref<64x128xf32, #tpu.memory_space<vmem>>, %arg4: memref<32x128xf32, #tpu.memory_space<vmem>>, %arg5: memref<1x32x128xf32, #tpu.memory_space<vmem>>) attributes {dimension_semantics = [#tpu.dimension_semantics<parallel>, #tpu.dimension_semantics<parallel>], iteration_bounds = array<i64: 2, 1>, scalar_prefetch = 0 : i64, scratch_operands = 0 : i64, tpu.core_type = #tpu.core_type<tc>, window_params = [{transform_indices = @transform_0, window_bounds = array<i64: 1, 32, 1>}, {pipeline_mode = #tpu.pipeline_mode<synchronous>, transform_indices = @transform_1, window_bounds = array<i64: 64, 128>}, {pipeline_mode = #tpu.pipeline_mode<synchronous>, transform_indices = @transform_2, window_bounds = array<i64: 32, 128>}, {transform_indices = @transform_3, window_bounds = array<i64: 1, 32, 128>}]} {
    %c0 = arith.constant 0 : index
    %c0_0 = arith.constant 0 : index
    %c0_1 = arith.constant 0 : index
    %0 = vector.load %arg2[%c0, %c0_0, %c0_1] : memref<1x32x1xi32, #tpu.memory_space<vmem>>, vector<1x32x1xi32>
    %1 = vector.shape_cast %0 : vector<1x32x1xi32> to vector<32x1xi32>
    %c63_i32 = arith.constant 63 : i32
    %2 = vector.broadcast %c63_i32 : i32 to vector<32x1xi32>
    %3 = arith.minsi %1, %2 : vector<32x1xi32>
    %c0_i32 = arith.constant 0 : i32
    %4 = vector.broadcast %c0_i32 : i32 to vector<32x1xi32>
    %5 = arith.maxsi %3, %4 : vector<32x1xi32>
    %6 = tpu.iota {dimensions = array<i32: 1>} : vector<32x64xi32>
    %7 = vector.broadcast %5 : vector<32x1xi32> to vector<32x64xi32>
    %8 = arith.cmpi eq, %7, %6 : vector<32x64xi32>
    %9 = arith.extui %8 : vector<32x64xi1> to vector<32x64xi32>
    %10 = arith.sitofp %9 : vector<32x64xi32> to vector<32x64xf32>
    %c0_2 = arith.constant 0 : index
    %c0_3 = arith.constant 0 : index
    %11 = vector.load %arg3[%c0_2, %c0_3] : memref<64x128xf32, #tpu.memory_space<vmem>>, vector<64x128xf32>
    %cst = arith.constant dense<0.000000e+00> : vector<32x128xf32>
    %12 = tpu.matmul %10, %11, %cst {dimension_numbers = #tpu.dot_dimension_numbers<[1], [0], [0], [1], [0, 0, 1, 1], [], []>} : vector<32x64xf32>, vector<64x128xf32>, vector<32x128xf32> -> vector<32x128xf32>
    %c32_i32 = arith.constant 32 : i32
    %13 = arith.muli %arg1, %c32_i32 : i32
    %14 = tpu.assume_multiple %13, 32 : i32
    %15 = arith.index_cast %14 : i32 to index
    %c0_4 = arith.constant 0 : index
    %16 = vector.load %arg4[%15, %c0_4] : memref<32x128xf32, #tpu.memory_space<vmem>>, vector<32x128xf32>
    %17 = arith.addf %12, %16 : vector<32x128xf32>
    %c0_5 = arith.constant 0 : index
    %c0_6 = arith.constant 0 : index
    %c0_7 = arith.constant 0 : index
    %18 = vector.load %arg5[%c0_5, %c0_6, %c0_7] : memref<1x32x128xf32, #tpu.memory_space<vmem>>, vector<1x32x128xf32>
    %19 = vector.shape_cast %18 : vector<1x32x128xf32> to vector<32x128xf32>
    %20 = vector.shape_cast %17 : vector<32x128xf32> to vector<1x32x128xf32>
    tpu.vector_store %arg5[%c0_5, %c0_6, %c0_7], %20 {strides = array<i32>} : memref<1x32x128xf32, #tpu.memory_space<vmem>>, vector<1x32x128xf32>,
    return
  }
  func.func @transform_0(%arg0: i32, %arg1: i32) -> (i32, i32, i32) {
    %c0_i32 = arith.constant 0 : i32
    %c0_i32_0 = arith.constant 0 : i32
    return %arg0, %arg1, %c0_i32 : i32, i32, i32
  }
  func.func @transform_1(%arg0: i32, %arg1: i32) -> (i32, i32) {
    %c0_i32 = arith.constant 0 : i32
    %c0_i32_0 = arith.constant 0 : i32
    %c0_i32_1 = arith.constant 0 : i32
    return %c0_i32, %c0_i32_0 : i32, i32
  }
  func.func @transform_2(%arg0: i32, %arg1: i32) -> (i32, i32) {
    %c0_i32 = arith.constant 0 : i32
    %c0_i32_0 = arith.constant 0 : i32
    %c0_i32_1 = arith.constant 0 : i32
    return %c0_i32, %c0_i32_0 : i32, i32
  }
  func.func @transform_3(%arg0: i32, %arg1: i32) -> (i32, i32, i32) {
    %c0_i32 = arith.constant 0 : i32
    %c0_i32_0 = arith.constant 0 : i32
    return %arg0, %arg1, %c0_i32 : i32, i32, i32
  }
}

</mosaic_0001>

<bundles_post_ra>
// kernel: tpu_custom_call.1
= control target key start
LH: loop header
LB: loop body
LE: loop exit
PB: predicated region body
PF: predicated region fallthrough
CT: control target
= control target key end

     0   :  { %8 = vsyncpa [#allocation3], 0  ;;  %s960_s0 = inlined_call_operand.vmem [shape: s32[2,32,1], index: 0, kind: input, shape index: {}]   ;;  %s961_s1 = inlined_call_operand.vmem [shape: f32[64,128], index: 1, kind: input, shape index: {}]   ;;  %s962_s2 = inlined_call_operand.hbm [shape: f32[32,128], index: 2, kind: input, shape index: {}]   ;;  %s963_s3 = inlined_call_operand.hbm [shape: f32[2,32,128], index: 3, kind: output, shape index: {}]  }
   0x1   :  { %9 = vsyncpa [#allocation4], 0 }
   0x2   :  { %11 = vsyncpa [#allocation4 + $0x1], 0  ;;  %s783_s12 = smov 0   ;;  %s785_s13 = smov 0  }
   0x3   :  { %s787_s14 = smov 0   ;;  %s789_s15 = smov 0  }
   0x4   :  { %s791_s16 = smov 0   ;;  %s793_s17 = smov 0  }
   0x5 LB: > { %s486_s18 = sadd.s32 4294967295, %s753_s17   ;;  %s487_s19 = sadd.s32 4294967294, %s753_s17   ;;  %s753_s17 = sphi %s793_s17, %s17_s17   ;;  %s749_s16 = sphi %s791_s16, %s981_s16   ;;  %s745_s15 = sphi %s789_s15, %s980_s15   ;;  %s741_s14 = sphi %s787_s14, %s979_s14   ;;  %s737_s13 = sphi %s785_s13, %s978_s13   ;;  %s733_s12 = sphi %s783_s12, %s977_s12  }
   0x6   : > { %s29_s20 = sadd.s32 1, %s749_s16  ;;  %s108_s21 = sadd.s32 1, %s741_s14 }
   0x7   : > { %p31_p0 = scmp.ge.s32.totalorder %s29_s20, 2  ;;  %p118_p1 = scmp.ne.s32.totalorder %s741_s14, %s737_s13 }
   0x8   : > { %p119_p2 = scmp.eq.s32.totalorder %s486_s18, 1  ;;  %p124_p3 = scmp.ne.s32.totalorder %s737_s13, %s733_s12 }
   0x9   : > { %s983_s20 = smov (%p31_p0, %s29_s20), 0  ;;  %p125_p5 = scmp.eq.s32.totalorder %s487_s19, 1 }
   0xa   : > { %p823_p4 = por %p119_p2, %p118_p1  ;;  %s103_s23 = ssub.s32 %s749_s16, %s983_s20 }
   0xb   : > { %p488_p6 = scmp.ge.s32.totalorder %s753_s17, 1  ;;  %p106_p7 = scmp.eq.s32.totalorder %s103_s23, 0 }
   0xc   : > { %s968_s22 = scalar_select %p823_p4, 1, 0 }
   0xd   : > { %p830_p8 = por %p125_p5, %p124_p3  ;;  %p132_p9 = scmp.lt.s32.totalorder %s753_s17, 3 }
   0xe   : > { %s836_s25 = scalar_select %p106_p7, %s741_s14, %s108_s21  }
   0xf   : > { %s969_s24 = scalar_select %p830_p8, 1, 0 }
  0x10   : > { %p838_p10 = pnand %p488_p6, %p132_p9  ;;  %p842_p11 = scmp.eq.s32.totalorder %s486_s18, 0 }
  0x11   : > { %s755_s28 = smov [#allocation2]   ;;  %s643_s6 = scalar_lea.hbm %s962_s2, 512 }
  0x12   : > { %s970_s26 = scalar_select %p838_p10, 1, 0 }
  0x13   : > { %s971_s27 = scalar_select %p842_p11, 1, 0 }
  0x14   : > { %p575_p12 = pneg %p838_p10  ;;  %s147_s29 = sshll.u32 %s755_s28, 4  ;;  %s148_s29 = int_to_ptr.vmem [resolvable:$true] %s147_s29 }
  0x15   : > { %p644_p0 = scmp.ne.s32.totalorder %s962_s2, %s643_s6  ;;  %p650_p5 = scmp.lt.u32.totalorder %s643_s6, %s962_s2 }
  0x16   : > { %p850_p13 = pnand %p842_p11, %p575_p12 }
  0x18   : > { %p645_p1 = pneg %p850_p13 }
  0x1a   : > { %p646_p2 = pnand %p645_p1, %p644_p0 }
  0x1c   : > { %p647_p3 = pneg %p646_p2 }
  0x1e   : > { %p652_p6 = pnand %p650_p5, %p647_p3 }
  0x20   : > { %655 = shalt.err (!%p652_p6)
}
  0x21   : > { %s656_s11 = scalar_lea.vmem %s148_s29, 512  ;;  %p664_p8 = scmp.lt.s32.totalorder %s148_s29, %s148_s29 }
  0x22   : > { %p657_p7 = scmp.ne.s32.totalorder %s148_s29, %s656_s11  ;;  %p665_p4 = scmp.lt.s32.totalorder %s656_s11, %s656_s11 }
  0x24   : > { %p659_p9 = pnand %p657_p7, %p645_p1  ;;  %p666_p11 = por %p665_p4, %p664_p8 }
  0x26   : > { %p660_p12 = pneg %p659_p9 }
  0x28   : > { %p667_p10 = pnand %p666_p11, %p660_p12 }
  0x2a   : > { %670 = shalt.err (!%p667_p10)
}
  0x2b   : > { %s756_s18 = smov 128   ;;  %s757_s19 = smov 8  }
  0x2c   : > { %578 = dma.hbm_to_vmem [thread:$0]  (!%p850_p13), %s962_s2, 512, %s148_s29, [#allocation3], %s756_s18, %s756_s18, %s757_s19  }
  0x2d   : > { %p973_p0 = scmp.ne.s32.totalorder %s970_s26, 0 }
  0x2e   : > { %p974_p2 = scmp.ne.s32.totalorder (!%p973_p0), %s971_s27, 0 }
  0x2f   : > { %176 = sbr.rel (%p973_p0) target bundleno = 431 (0x1af), region = 32 }
  0x36   : > { %724 = dma.done.wait (%p974_p2), [#allocation3], 512  }
  0x37   : > { %726 = vsyncadd (%p974_p2), [#allocation3], 4294966784  ;;  %p205_p4 = scmp.lt.s32.totalorder %s745_s15, 1  ;;  %v758_v0 = vmov 0   ;;  %v261_v8 = vld [vmem:[%s961_s1] sm:$0xff]  ;;  %v262_v9 = vld [vmem:[%s961_s1 + $0x8] sm:$0xff]  ;;  %v235_v25 = vlaneseq }
  0x38   : > { %642 = vset.pattern.permute.xlu1 %v758_v0  ;;  %641 = vset.pattern.permute.xlu0 %v758_v0  ;;  %v263_v11 = vld [vmem:[%s961_s1 + $0x10] sm:$0xff]  ;;  %v264_v12 = vld [vmem:[%s961_s1 + $0x18] sm:$0xff]  ;;  %v545_v15 = vpack.c.bf16 %v262_v9, %v261_v8  ;;  %v265_v19 = vld [vmem:[%s961_s1 + $0x20] sm:$0xff]  ;;  %vm275_vm8 = vcmask 523264   ;;  %v759_v29 = vmov 0.0   ;;  %s510_s7 = sshll.u32 %s745_s15, 9 }
  0x39   : > { %s206_s28 = scalar_select %p205_p4, %s745_s15, 1  ;;  %v549_v18 = vpack.c.bf16 %v264_v12, %v263_v11  ;;  %v266_v20 = vld [vmem:[%s961_s1 + $0x28] sm:$0xff]  ;;  %v267_v22 = vld [vmem:[%s961_s1 + $0x30] sm:$0xff]  ;;  %v268_v23 = vld [vmem:[%s961_s1 + $0x38] sm:$0xff]  ;;  %v236_v26 = vand.u32 127, %v235_v25 }
  0x3a   : > { %546 = vmatprep.subr.bf16.mxu0 %v545_v15  ;;  %561 = vmatprep.subr.bf16.mxu1 %v545_v15  ;;  %v553_v21 = vpack.c.bf16 %v266_v20, %v265_v19  ;;  %v557_v24 = vpack.c.bf16 %v268_v23, %v267_v22  ;;  %v272_v36 = vld [vmem:[#allocation2 + $0x8] sm:$0xff]  ;;  %v271_v37 = vld [vmem:[#allocation2] sm:$0xff]  ;;  %v274_v42 = vld [vmem:[#allocation2 + $0x18] sm:$0xff]  ;;  %s912_s10 = scalar_lea.hbm %s963_s3, %s510_s7  ;;  %p975_p10 = scmp.ne.s32.totalorder %s968_s22, 0 }
  0x3b   : > { %s509_s30 = sshll.u32 %s206_s28, 5  ;;  %548 = vmatpush3.bf16.msra.mxu0 %v545_v15  ;;  %565 = vmatpush3.bf16.msra.mxu1 %v545_v15  ;;  %v273_v43 = vld [vmem:[#allocation2 + $0x10] sm:$0xff]  ;;  %s760_s18 = smov [#allocation5]  }
  0x3c   : > { %s212_s29 = scalar_lea.vmem %s960_s0, %s509_s30  ;;  %550 = vmatprep.subr.bf16.mxu0 %v549_v18  ;;  %562 = vmatprep.subr.bf16.mxu1 %v549_v18  ;;  %s675_s19 = sshll.u32 %s760_s18, 4  ;;  %s676_s19 = int_to_ptr.vmem [resolvable:$false] %s675_s19 }
  0x3d   : > { %v216_v1 = vld [vmem:[%s212_s29 + $0x8] sm:$0xff]  ;;  %v215_v2 = vld [vmem:[%s212_s29] sm:$0xff]  ;;  %v218_v3 = vld [vmem:[%s212_s29 + $0x18] sm:$0xff]  ;;  %s677_s21 = scalar_lea.vmem %s676_s19, 1024 }
  0x3e   : > { %vm221_vm0 = vcmp.lt.s32.totalorder %v216_v1, 63  ;;  %vm219_vm1 = vcmp.lt.s32.totalorder %v215_v2, 63  ;;  %vm225_vm2 = vcmp.lt.s32.totalorder %v218_v3, 63  ;;  %v217_v4 = vld [vmem:[%s212_s29 + $0x10] sm:$0xff]  ;;  %s201_s29 = sand.u32 1, %s737_s13  }
  0x3f   : > { %v222_v5 = vsel %vm221_vm0, %v216_v1, 63  ;;  %v220_v6 = vsel %vm219_vm1, %v215_v2, 63  ;;  %v226_v7 = vsel %vm225_vm2, %v218_v3, 63  ;;  %vm223_vm3 = vcmp.lt.s32.totalorder %v217_v4, 63  ;;  %552 = vmatpush3.bf16.msra.mxu0 %v549_v18  ;;  %566 = vmatpush3.bf16.msra.mxu1 %v549_v18  ;;  %s493_s26 = sshll.u32 %s201_s29, 5  ;;  %s914_s15 = scalar_lea.sflag [#allocation4], %s201_s29 }
  0x40   : > { %vm229_vm4 = vcmp.gt.s32.totalorder %v222_v5, 0  ;;  %vm227_vm5 = vcmp.gt.s32.totalorder %v220_v6, 0  ;;  %vm233_vm6 = vcmp.gt.s32.totalorder %v226_v7, 0  ;;  %v224_v10 = vsel %vm223_vm3, %v217_v4, 63  ;;  %554 = vmatprep.subr.bf16.mxu0 %v553_v21  ;;  %563 = vmatprep.subr.bf16.mxu1 %v553_v21  ;;  %s203_s27 = scalar_lea.vmem [#allocation5], %s493_s26 }
  0x41   : > { %v230_v13 = vsel %vm229_vm4, %v222_v5, 0  ;;  %v228_v14 = vsel %vm227_vm5, %v220_v6, 0  ;;  %vm231_vm7 = vcmp.gt.s32.totalorder %v224_v10, 0  ;;  %v234_v16 = vsel %vm233_vm6, %v226_v7, 0  ;;  %s393_s6 = sshll.u32 %s203_s27, 4  ;;  %s907_s6 = int_to_ptr.vmem [resolvable:$true] %s393_s6 }
  0x42   : > { %241 = vperm.xlu1 %642, %v230_v13   ;;  %238 = vperm.xlu0 %641, %v228_v14   ;;  %v232_v17 = vsel %vm231_vm7, %v224_v10, 0  ;;  %s671_s11 = scalar_lea.vmem %s907_s6, 512  ;;  %p678_p1 = scmp.lt.s32.totalorder %s907_s6, %s676_s19 }
  0x43   : > { %556 = vmatpush3.bf16.msra.mxu0 %v553_v21  ;;  %567 = vmatpush3.bf16.msra.mxu1 %v553_v21  ;;  %p672_p8 = scmp.ne.s32.totalorder %s907_s6, %s671_s11  ;;  %p679_p3 = scmp.lt.s32.totalorder %s677_s21, %s671_s11 }
  0x44   : > { %558 = vmatprep.subr.bf16.mxu0 %v557_v24  ;;  %564 = vmatprep.subr.bf16.mxu1 %v557_v24 }
  0x45   : > { %p673_p11 = pnand %p672_p8, %p975_p10  ;;  %p680_p5 = por %p679_p3, %p678_p1 }
  0x46   : > { %247 = vperm.xlu1 %642, %v234_v16   ;;  %244 = vperm.xlu0 %641, %v232_v17  }
  0x47   : > { %560 = vmatpush3.bf16.msra.mxu0 %v557_v24  ;;  %568 = vmatpush3.bf16.msra.mxu1 %v557_v24  ;;  %p674_p13 = pneg %p673_p11 }
  0x49   : > { %p681_p6 = pnand %p680_p5, %p674_p13 }
  0xc1   : > { %v242_v27 = vpop.permute.xlu1 %241  ;;  %v239_v28 = vpop.permute.xlu0 %238 }
  0xc2   : > { %vm250_vm9 = vcmp.eq.s32.totalorder %v242_v27, %v236_v26  ;;  %vm249_vm10 = vcmp.eq.s32.totalorder %v239_v28, %v236_v26 }
  0xc3   : > { %v497_v30 = vsel %vm250_vm9, 1.0, %v759_v29  ;;  %v496_v31 = vsel %vm249_vm10, 1.0, %v759_v29 }
  0xc4   : > { %539 = vmatprep.mubr.msk.f32.mxu0 %vm275_vm8, %v496_v31 }
  0xc5   : > { %v248_v32 = vpop.permute.xlu1 %247  ;;  %540 = vmatmul.mubr.msk.f32.vlgmr.msra.gmra.mrb[0].mxu0 %vm275_vm8, %v497_v30  ;;  %v245_v33 = vpop.permute.xlu0 %244 }
  0xc6   : > { %vm252_vm11 = vcmp.eq.s32.totalorder %v248_v32, %v236_v26  ;;  %vm251_vm12 = vcmp.eq.s32.totalorder %v245_v33, %v236_v26 }
  0xc7   : > { %v499_v34 = vsel %vm252_vm11, 1.0, %v759_v29  ;;  %v498_v35 = vsel %vm251_vm12, 1.0, %v759_v29 }
  0xc8   : > { %542 = vmatprep.mubr.msk.f32.mxu1 %vm275_vm8, %v498_v35 }
  0xc9   : > { %543 = vmatmul.mubr.msk.f32.vlgmr.msra.gmra.mrb[0].mxu1 %vm275_vm8, %v499_v34 }
 0x198   : > { %v541_v38 = vpop.f32.mrb[0].mxu0 }
 0x199   : > { %v360_v39 = vadd.f32 %v541_v38, %v272_v36  ;;  %v354_v40 = vpop.f32.mrb[1].mxu0 }
 0x19a   : > { %v355_v41 = vadd.f32 %v354_v40, %v271_v37 }
 0x19b   : > { %374 = vst [vmem:[%s203_s27 + $0x8] sm:$0xff] %v360_v39 }
 0x19c   : > { %373 = vst [vmem:[%s203_s27] sm:$0xff] %v355_v41  ;;  %v544_v44 = vpop.f32.mrb[0].mxu1 }
 0x19d   : > { %v370_v45 = vadd.f32 %v544_v44, %v274_v42  ;;  %v364_v46 = vpop.f32.mrb[1].mxu1 }
 0x19e   : > { %v365_v47 = vadd.f32 %v364_v46, %v273_v43 }
 0x19f   : > { %376 = vst [vmem:[%s203_s27 + $0x18] sm:$0xff] %v370_v45 }
 0x1a0   : > { %375 = vst [vmem:[%s203_s27 + $0x10] sm:$0xff] %v365_v47 }
 0x1a1   : > { %684 = shalt.err (!%p681_p6)
}
 0x1a2   : > { %s685_s23 = scalar_lea.hbm %s912_s10, 512  ;;  %s689_s4 = scalar_lea.hbm %s963_s3, 1024 }
 0x1a3   : > { %p686_p7 = scmp.ne.s32.totalorder %s912_s10, %s685_s23  ;;  %p690_p0 = scmp.lt.u32.totalorder %s912_s10, %s963_s3 }
 0x1a4   : > { %p691_p2 = scmp.lt.u32.totalorder %s689_s4, %s685_s23  ;;  %p693_p8 = scmp.lt.u32.totalorder %s685_s23, %s912_s10 }
 0x1a5   : > { %p687_p9 = pnand %p686_p7, %p975_p10 }
 0x1a6   : > { %p692_p4 = por %p691_p2, %p690_p0 }
 0x1a7   : > { %p688_p12 = pneg %p687_p9 }
 0x1a8   : > { %p694_p11 = por %p693_p8, %p692_p4 }
 0x1aa   : > { %p695_p13 = pnand %p694_p11, %p688_p12 }
 0x1ac   : > { %698 = shalt.err (!%p695_p13)
}
 0x1ad   : > { %s761_s26 = smov 128   ;;  %s762_s27 = smov 8  }
 0x1ae   : > { %573 = dma.vmem_to_hbm [thread:$0]  (%p975_p10), %s907_s6, 512, %s912_s10, %s914_s15, %s761_s26, %s761_s26, %s762_s27  }
 0x1af PF: > { %p585_p1 = scmp.ge.s32.totalorder %s753_s17, 2  ;;  %s408_s7 = sand.u32 1, %s733_s12  }
 0x1b0   : > { %p976_p3 = scmp.ne.s32.totalorder %s969_s24, 0  ;;  %s409_s8 = scalar_lea.sflag [#allocation4], %s408_s7 }
 0x1b2   : > { %p580_p5 = pnand %p585_p1, %p976_p3 }
 0x1b4   : > { %728 = dma.done.wait (!%p580_p5), %s409_s8, 512  }
 0x1b5   : > { %730 = vsyncadd (!%p580_p5), %s409_s8, 4294966784  ;;  %s17_s17 = sadd.s32 1, %s753_s17   ;;  %s977_s12 = smov %s737_s13 }
 0x1b6   : > { %p14_p6 = scmp.ge.s32.totalorder %s17_s17, 4   ;;  %s978_s13 = smov %s741_s14 }
 0x1b7   : > { %s979_s14 = smov %s836_s25  ;;  %s980_s15 = smov %s749_s16 }
 0x1b8   : > { %s981_s16 = smov %s983_s20  ;;  %16 = sbr.rel (!%p14_p6) target bundleno = 5 (0x5), region = 73 }
 0x1bf   :  { %414 = vsyncpa [#allocation3], 1 }
 0x1c0   :  { %416 = vsyncpa [#allocation3 + $0x1], 1 }
 0x1c1   :  { %417 = vsyncpa [#allocation4], 1 }
 0x1c2   :  { %419 = vsyncpa [#allocation4 + $0x1], 1 }

</bundles_post_ra>
